<compile_context>
chip_gen: v7x
topology: tpu7x:2x2x1
jax: 0.10.0
libtpu: 0.0.40
codegen_flags: <defaults>
</compile_context>

<pallas_src>
import functools

import jax
import jax.numpy as jnp
from jax.experimental import pallas as pl
from jax.experimental.pallas import tpu as pltpu

HRR_SIZE = 16
NUM_DECODERS = 16


def _round_up(x, m):
    return ((x + m - 1) // m) * m


def _featurize_kernel(x_ref, w_ref, out_ref):
    """out = x @ W  — one MXU matmul per batch tile.

    x_ref   : (Bb, 2N)          [problemhrr | lemmahrr] rows for this tile
    w_ref   : (2N, (2+2D)*N)    constant featurizer matrix (same block every step)
    out_ref : (Bb, (2+2D)*N)    per-sample torch.cat(...) rows (lane-dense)
    """
    out_ref[...] = jnp.dot(
        x_ref[...], w_ref[...], preferred_element_type=jnp.float32
    ).astype(out_ref.dtype)


def _build_featurizer_matrix(decoders):
    """Fold pass-through + all circular-convolution associations into one matrix.

    W is defined so that  [p | l] @ W  equals
      cat([p, l, assoc(dec_0, p), ..., assoc(dec_{D-1}, p),
                 assoc(dec_0, l), ..., assoc(dec_{D-1}, l)]).
    Pure indexing / zero FLOPs; built from the parameters only.
    """
    D, N = decoders.shape
    dt = decoders.dtype
    # circulant(dec_d)[j, k] = dec_d[(k - j) % N]
    idx = (jnp.arange(N)[None, :] - jnp.arange(N)[:, None]) % N           # (N, N)
    circ = decoders[:, idx]                                               # (D, N, N)
    circ_flat = jnp.transpose(circ, (1, 0, 2)).reshape(N, D * N)          # [j, d*N + k]

    eye = jnp.eye(N, dtype=dt)
    z_nn = jnp.zeros((N, N), dtype=dt)
    z_nd = jnp.zeros((N, D * N), dtype=dt)
    w_p = jnp.concatenate([eye, z_nn, circ_flat, z_nd], axis=1)           # p-coefficient rows
    w_l = jnp.concatenate([z_nn, eye, z_nd, circ_flat], axis=1)           # l-coefficient rows
    return jnp.concatenate([w_p, w_l], axis=0)                            # (2N, (2+2D)*N)


def decoder_featurizer(problemhrr, lemmahrr, decoders, *, batch_block=128):
    """problemhrr/lemmahrr: (N,) or (B, N) float32; decoders: (D, N) float32.

    Returns the torch.cat(...) feature vector of length (2+2D)*N per sample:
    shape ((2+2D)*N,) for 1-D inputs (matching the PyTorch forward), or
    (B, (2+2D)*N) for batched inputs.
    """
    single = problemhrr.ndim == 1
    p = problemhrr[None, :] if single else problemhrr
    l = lemmahrr[None, :] if single else lemmahrr
    B, N = p.shape
    D = decoders.shape[0]
    out_cols = (2 + 2 * D) * N

    # TODO(synk): for realistic HRR sizes (N >= 1024) this O(D*N^2) matrix no
    # longer fits comfortably in VMEM (64 MiB on v7x); switch to an in-kernel
    # roll/FFT formulation before scaling N.  At N=16 it is ~68 KiB.
    w = _build_featurizer_matrix(decoders)            # (2N, out_cols), batch-invariant

    x = jnp.concatenate([p, l], axis=-1)              # (B, 2N): single packed input

    # Batch tile: multiple of 8 sublanes, capped at batch_block.
    bb = max(8, (min(batch_block, _round_up(B, 8)) // 8) * 8)
    b_pad = _round_up(B, bb)
    if b_pad != B:
        x = jnp.pad(x, ((0, b_pad - B), (0, 0)))

    out = pl.pallas_call(
        _featurize_kernel,
        out_shape=jax.ShapeDtypeStruct((b_pad, out_cols), p.dtype),
        grid=(b_pad // bb,),
        in_specs=[
            pl.BlockSpec((bb, 2 * N), lambda i: (i, 0)),
            # Constant block index -> W stays resident in VMEM, fetched once.
            pl.BlockSpec((2 * N, out_cols), lambda i: (0, 0)),
        ],
        out_specs=pl.BlockSpec((bb, out_cols), lambda i: (i, 0)),
        compiler_params=pltpu.CompilerParams(
            dimension_semantics=("parallel",)),       # v7x: shard batch over both TCs
    )(x, w)

    out = out[:B]
    return out[0] if single else out


def _reference(problemhrr, lemmahrr, decoders):
    """Pure-JAX single-sample reference (circular-convolution associate)."""
    N = problemhrr.shape[0]
    idx = (jnp.arange(N)[None, :] - jnp.arange(N)[:, None]) % N
    assoc_p = decoders @ problemhrr[idx]
    assoc_l = decoders @ lemmahrr[idx]
    return jnp.concatenate(
        [problemhrr, lemmahrr, assoc_p.reshape(-1), assoc_l.reshape(-1)])


if __name__ == "__main__":
    key = jax.random.PRNGKey(0)
    k_p, k_l, k_d = jax.random.split(key, 3)

    B = 32
    problemhrr = jax.random.normal(k_p, (B, HRR_SIZE), dtype=jnp.float32)
    lemmahrr = jax.random.normal(k_l, (B, HRR_SIZE), dtype=jnp.float32)
    # Deterministic stand-in for the nn.Parameter(torch.Tensor(hrr_size)) bank.
    decoders = jax.random.normal(k_d, (NUM_DECODERS, HRR_SIZE), dtype=jnp.float32)

    out_len = (2 + 2 * NUM_DECODERS) * HRR_SIZE

    # Batched call: one pallas_call for all B samples, grid of batch tiles.
    featurize = jax.jit(functools.partial(decoder_featurizer, batch_block=8))
    out = jax.block_until_ready(featurize(problemhrr, lemmahrr, decoders))

    ref = jax.vmap(_reference, in_axes=(0, 0, None))(problemhrr, lemmahrr, decoders)
    assert out.shape == (B, out_len), out.shape
    assert jnp.allclose(out, ref, atol=1e-5, rtol=1e-5), "batched mismatch vs reference"

    # Single-sample call (matches the original module's 1-D forward).
    out1 = jax.block_until_ready(
        jax.jit(decoder_featurizer)(problemhrr[0], lemmahrr[0], decoders))
    assert out1.shape == (out_len,), out1.shape
    assert jnp.allclose(out1, ref[0], atol=1e-5, rtol=1e-5), "single-sample mismatch"

    print("KERNEL_OK")
</pallas_src>

<mosaic_0001>
module attributes {stable_mosaic.version = 11 : i64} {
  func.func @_featurize_kernel(%arg0: i32, %arg1: memref<8x32xf32, #tpu.memory_space<vmem>>, %arg2: memref<32x544xf32, #tpu.memory_space<vmem>>, %arg3: memref<8x544xf32, #tpu.memory_space<vmem>>) attributes {dimension_semantics = [#tpu.dimension_semantics<parallel>], iteration_bounds = array<i64: 4>, scalar_prefetch = 0 : i64, scratch_operands = 0 : i64, tpu.core_type = #tpu.core_type<tc>, window_params = [{transform_indices = @transform_0, window_bounds = array<i64: 8, 32>}, {pipeline_mode = #tpu.pipeline_mode<synchronous>, transform_indices = @transform_1, window_bounds = array<i64: 32, 544>}, {transform_indices = @transform_2, window_bounds = array<i64: 8, 544>}]} {
    %c0 = arith.constant 0 : index
    %c0_0 = arith.constant 0 : index
    %0 = vector.load %arg1[%c0, %c0_0] : memref<8x32xf32, #tpu.memory_space<vmem>>, vector<8x32xf32>
    %c0_1 = arith.constant 0 : index
    %c0_2 = arith.constant 0 : index
    %1 = vector.load %arg2[%c0_1, %c0_2] : memref<32x544xf32, #tpu.memory_space<vmem>>, vector<32x544xf32>
    %cst = arith.constant dense<0.000000e+00> : vector<8x544xf32>
    %2 = tpu.matmul %0, %1, %cst {dimension_numbers = #tpu.dot_dimension_numbers<[1], [0], [0], [1], [0, 0, 1, 1], [], []>} : vector<8x32xf32>, vector<32x544xf32>, vector<8x544xf32> -> vector<8x544xf32>
    %c0_3 = arith.constant 0 : index
    %c0_4 = arith.constant 0 : index
    %3 = vector.load %arg3[%c0_3, %c0_4] : memref<8x544xf32, #tpu.memory_space<vmem>>, vector<8x544xf32>
    tpu.vector_store %arg3[%c0_3, %c0_4], %2 {strides = array<i32>} : memref<8x544xf32, #tpu.memory_space<vmem>>, vector<8x544xf32>,
    return
  }
  func.func @transform_0(%arg0: i32) -> (i32, i32) {
    %c0_i32 = arith.constant 0 : i32
    %c0_i32_0 = arith.constant 0 : i32
    return %arg0, %c0_i32 : i32, i32
  }
  func.func @transform_1(%arg0: i32) -> (i32, i32) {
    %c0_i32 = arith.constant 0 : i32
    %c0_i32_0 = arith.constant 0 : i32
    %c0_i32_1 = arith.constant 0 : i32
    return %c0_i32, %c0_i32_0 : i32, i32
  }
  func.func @transform_2(%arg0: i32) -> (i32, i32) {
    %c0_i32 = arith.constant 0 : i32
    %c0_i32_0 = arith.constant 0 : i32
    return %arg0, %c0_i32 : i32, i32
  }
}

</mosaic_0001>

<bundles_post_ra>
// kernel: decoder_featurizer.1
= control target key start
LH: loop header
LB: loop body
LE: loop exit
PB: predicated region body
PF: predicated region fallthrough
CT: control target
= control target key end

     0   :  { %7 = vsyncpa [#allocation3], 0  ;;  %s795_s0 = inlined_call_operand.vmem [shape: f32[32,32], index: 0, kind: input, shape index: {}]   ;;  %s796_s1 = inlined_call_operand.vmem [shape: f32[32,544], index: 1, kind: input, shape index: {}]   ;;  %s797_s2 = inlined_call_operand.hbm [shape: f32[32,544], index: 2, kind: output, shape index: {}]  }
   0x1   :  { %9 = vsyncpa [#allocation3 + $0x1], 0  ;;  %s631_s9 = smov 0   ;;  %s633_s10 = smov 0  }
   0x2   :  { %s635_s11 = smov 0   ;;  %s637_s12 = smov 0  }
   0x3 LB: > { %s652_s13 = sadd.s32 4294967295, %s610_s12   ;;  %s455_s14 = sadd.s32 4294967294, %s610_s12   ;;  %s610_s12 = sphi %s637_s12, %s803_s12   ;;  %s606_s11 = sphi %s635_s11, %s802_s11   ;;  %s602_s10 = sphi %s633_s10, %s801_s10   ;;  %s598_s9 = sphi %s631_s9, %s800_s9  }
   0x4   : > { %s656_s15 = sadd.s32 1, %s610_s12   ;;  %s69_s16 = sadd.s32 1, %s606_s11 }
   0x5   : > { %s66_s17 = ssub.s32 %s610_s12, %s656_s15  ;;  %p79_p0 = scmp.ne.s32.totalorder %s606_s11, %s602_s10 }
   0x6   : > { %p67_p1 = scmp.eq.s32.totalorder %s66_s17, 0  ;;  %p80_p2 = scmp.eq.s32.totalorder %s652_s13, 3 }
   0x7   : > { %p85_p3 = scmp.ne.s32.totalorder %s602_s10, %s598_s9  ;;  %p86_p4 = scmp.eq.s32.totalorder %s455_s14, 3 }
   0x8   : > { %s667_s18 = scalar_select %p67_p1, %s606_s11, %s69_s16  }
   0x9   : > { %p669_p5 = por %p80_p2, %p79_p0  ;;  %p673_p6 = por %p86_p4, %p85_p3 }
   0xa   : > { %p458_p7 = scmp.ge.s32.totalorder %s610_s12, 1  ;;  %p114_p8 = scmp.lt.s32.totalorder %s610_s12, 5 }
   0xc   : > { %p115_p9 = pnand %p458_p7, %p114_p8 }
   0xd   : > { %v141_v0 = vld [vmem:[%s796_s1 + $0x8] sm:$0xff] (!%p115_p9)  ;;  %v146_v1 = vld [vmem:[%s796_s1 + $0x30] sm:$0xff] (!%p115_p9)  ;;  %v140_v2 = vld [vmem:[%s796_s1] sm:$0xff] (!%p115_p9)  ;;  %p135_p10 = scmp.lt.s32.totalorder (!%p115_p9), %s652_s13, 3  ;;  %v612_v7 = vmov (!%p115_p9), 0.0   ;;  %vm160_vm0 = vcmask (!%p115_p9), 261120  }
   0xe   : > { %118 = sbr.rel (%p115_p9) target bundleno = 260 (0x104), region = 28  ;;  %v482_v3 = vpack.c.bf16 (!%p115_p9), %v146_v1, %v141_v0  ;;  %v145_v4 = vld [vmem:[%s796_s1 + $0x28] sm:$0xff] (!%p115_p9)  ;;  %v151_v5 = vld [vmem:[%s796_s1 + $0x58] sm:$0xff] (!%p115_p9)  ;;  %v156_v6 = vld [vmem:[%s796_s1 + $0x80] sm:$0xff] (!%p115_p9)  ;;  %228 = vmatprep.mubr.f32.mxu0 (!%p115_p9), %v612_v7  ;;  %299 = vmatprep.mubr.f32.mxu1 (!%p115_p9), %v612_v7  ;;  %v613_v29 = vmov (!%p115_p9), 0.0|0.0   ;;  %vm614_vm1 = vmmov (!%p115_p9), 0  }
   0xf   : > { %v484_v8 = vpack.c.bf16 (!%p115_p9), %v145_v4, %v140_v2  ;;  %v486_v9 = vpack.c.bf16 (!%p115_p9), %v156_v6, %v151_v5  ;;  %v150_v10 = vld [vmem:[%s796_s1 + $0x50] sm:$0xff] (!%p115_p9)  ;;  %v155_v11 = vld [vmem:[%s796_s1 + $0x78] sm:$0xff] (!%p115_p9)  ;;  %v148_v13 = vld [vmem:[%s796_s1 + $0x40] sm:$0xff] (!%p115_p9)  ;;  %s132_s28 = sand.u32 (!%p115_p9), 1, %s602_s10   ;;  %s505_s3 = smul.u32 (!%p115_p9), 640, %s652_s13 }
  0x10   : > { %v143_v12 = vld [vmem:[%s796_s1 + $0x18] sm:$0xff] (!%p115_p9)  ;;  %483 = vmatprep.subr.bf16.mxu0 (!%p115_p9), %v482_v3  ;;  %v142_v14 = vld [vmem:[%s796_s1 + $0x10] sm:$0xff] (!%p115_p9)  ;;  %v488_v16 = vpack.c.bf16 (!%p115_p9), %v155_v11, %v150_v10  ;;  %v144_v19 = vld [vmem:[%s796_s1 + $0x20] sm:$0xff] (!%p115_p9)  ;;  %s504_s29 = smul.u32 (!%p115_p9), 40, %s132_s28  ;;  %s615_s14 = smov (!%p115_p9), [#allocation2]  }
  0x11   : > { %v147_v15 = vld [vmem:[%s796_s1 + $0x38] sm:$0xff] (!%p115_p9)  ;;  %485 = vmatpush1.bf16.msra.mxu0 (!%p115_p9), %v484_v8  ;;  %v490_v17 = vpack.c.bf16 (!%p115_p9), %v148_v13, %v143_v12  ;;  %v149_v20 = vld [vmem:[%s796_s1 + $0x48] sm:$0xff] (!%p115_p9)  ;;  %v158_v22 = vld [vmem:[%s796_s1 + $0x90] sm:$0xff] (!%p115_p9)  ;;  %s752_s7 = scalar_lea.hbm (!%p115_p9), %s797_s2, %s505_s3  ;;  %s552_s16 = sshll.u32 (!%p115_p9), %s615_s14, 4  ;;  %s553_s16 = int_to_ptr.vmem [resolvable:$false] %s552_s16 }
  0x12   : > { %v492_v18 = vpack.c.bf16 (!%p115_p9), %v147_v15, %v142_v14  ;;  %v153_v21 = vld [vmem:[%s796_s1 + $0x68] sm:$0xff] (!%p115_p9)  ;;  %487 = vmatprep.subr.bf16.mxu0 (!%p115_p9), %v486_v9  ;;  %v152_v23 = vld [vmem:[%s796_s1 + $0x60] sm:$0xff] (!%p115_p9)  ;;  %v499_v28 = vpack.c.bf16 (!%p115_p9), %v149_v20, %v144_v19  ;;  %v154_v30 = vld [vmem:[%s796_s1 + $0x70] sm:$0xff] (!%p115_p9)  ;;  %s134_s30 = scalar_lea.vmem (!%p115_p9), [#allocation2], %s504_s29 }
  0x13   : > { %v157_v24 = vld [vmem:[%s796_s1 + $0x88] sm:$0xff] (!%p115_p9)  ;;  %491 = vmatprep.subr.bf16.mxu1 (!%p115_p9), %v490_v17  ;;  %v494_v25 = vpack.c.bf16 (!%p115_p9), %v158_v22, %v153_v21  ;;  %v159_v31 = vld [vmem:[%s796_s1 + $0x98] sm:$0xff] (!%p115_p9)  ;;  %s396_s4 = sshll.u32 (!%p115_p9), %s134_s30, 4  ;;  %s754_s4 = int_to_ptr.vmem [resolvable:$true] %s396_s4 }
  0x14   : > { %493 = vmatpush1.bf16.msra.mxu1 (!%p115_p9), %v492_v18  ;;  %v496_v26 = vpack.c.bf16 (!%p115_p9), %v157_v24, %v152_v23  ;;  %v502_v32 = vpack.c.bf16 (!%p115_p9), %v159_v31, %v154_v30  ;;  %p555_p0 = scmp.lt.s32.totalorder (!%p115_p9), %s754_s4, %s553_s16 }
  0x15   : > { %s136_s17 = scalar_select %p135_p10, %s652_s13, 3  ;;  %489 = vmatpush1.bf16.msra.mxu0 %v488_v16  ;;  %495 = vmatprep.subr.bf16.mxu1 %v494_v25 }
  0x16   : > { %498 = vmatprep.subr.bf16.mxu0 %v613_v29  ;;  %s548_s13 = scalar_lea.vmem %s754_s4, 640 }
  0x17   : > { %s459_s27 = sshll.u32 %s136_s17, 3  ;;  %p549_p11 = scmp.ne.s32.totalorder %s754_s4, %s548_s13 }
  0x18   : > { %s138_s8 = scalar_lea.vmem %s795_s0, %s459_s27  ;;  %497 = vmatpush1.bf16.msra.mxu1 %v496_v26  ;;  %s554_s17 = scalar_lea.vmem %s553_s16, 1280 }
  0x19   : > { %v139_v27 = vld [vmem:[%s138_s8] sm:$0xff]  ;;  %s382_s8 = scalar_lea.sflag [#allocation3], %s132_s28  ;;  %p550_p12 = pnand %p549_p11, %p669_p5 }
  0x1a   : > { %460 = vmatmul.mubr.msk.f32.vlgmr.msra.gmra.mrb[0].mxu0 %vm160_vm0, %v139_v27  ;;  %p556_p1 = scmp.lt.s32.totalorder %s554_s17, %s548_s13 }
  0x1b   : > { %500 = vmatpush3.bf16.msra.mxu0 %v499_v28  ;;  %479 = vmatprep.mubr.msk.f32.mxu0 %vm614_vm1, %v612_v7  ;;  %p551_p13 = pneg %p550_p12 }
  0x1c   : > { %501 = vmatprep.subr.bf16.mxu0 %v613_v29  ;;  %461 = vmatmul.mubr.msk.f32.vlgmr.msra.gmra.mrb[0].mxu1 %vm160_vm0, %v139_v27  ;;  %p557_p2 = por %p556_p1, %p555_p0 }
  0x1e   : > { %p558_p3 = pnand %p557_p2, %p551_p13 }
  0x1f   : > { %503 = vmatpush3.bf16.msra.mxu0 %v502_v32 }
  0x22   : > { %480 = vmatmul.mubr.msk.f32.vlgmr.msra.gmra.mrb[2].mxu0 %vm160_vm0, %v139_v27 }
  0xed   : > { %v230_v33 = vpop.f32.mrb[0].mxu0 }
  0xee   : > { %376 = vst [vmem:[%s134_s30] sm:$0xff] %v230_v33  ;;  %v232_v34 = vpop.f32.mrb[1].mxu0 }
  0xef   : > { %377 = vst [vmem:[%s134_s30 + $0x8] sm:$0xff] %v232_v34  ;;  %v301_v35 = vpop.f32.mrb[0].mxu1 }
  0xf0   : > { %378 = vst [vmem:[%s134_s30 + $0x10] sm:$0xff] %v301_v35  ;;  %v303_v36 = vpop.f32.mrb[1].mxu1 }
  0xf1   : > { %379 = vst [vmem:[%s134_s30 + $0x18] sm:$0xff] %v303_v36 }
  0xf5   : > { %v372_v37 = vpop.f32.mrb[2].mxu0 }
  0xf6   : > { %380 = vst.msk [vmem:[%s134_s30 + $0x20] sm:$0xff] %vm160_vm0, %v372_v37  ;;  %v481_v38 = vpop.f32.mrb[3].mxu0 }
  0xf7   : > { %561 = shalt.err (!%p558_p3)
}
  0xf8   : > { %s562_s21 = scalar_lea.hbm %s752_s7, 640  ;;  %s566_s24 = scalar_lea.hbm %s797_s2, 2560 }
  0xf9   : > { %p563_p4 = scmp.ne.s32.totalorder %s752_s7, %s562_s21  ;;  %p567_p9 = scmp.lt.u32.totalorder %s752_s7, %s797_s2 }
  0xfa   : > { %p568_p10 = scmp.lt.u32.totalorder %s566_s24, %s562_s21  ;;  %p570_p12 = scmp.lt.u32.totalorder %s562_s21, %s752_s7 }
  0xfb   : > { %p564_p7 = pnand %p563_p4, %p669_p5 }
  0xfc   : > { %p569_p11 = por %p568_p10, %p567_p9 }
  0xfd   : > { %p565_p8 = pneg %p564_p7 }
  0xfe   : > { %p571_p13 = por %p570_p12, %p569_p11 }
 0x100   : > { %p572_p0 = pnand %p571_p13, %p565_p8 }
 0x102   : > { %575 = shalt.err (!%p572_p0)
}
 0x103   : > { %506 = dma.vmem_to_hbm [thread:$0]  (%p669_p5), %s754_s4, 640, %s752_s7, %s382_s8  }
 0x104 PF: > { %p512_p1 = scmp.ge.s32.totalorder %s610_s12, 2  ;;  %s408_s27 = sand.u32 1, %s598_s9  }
 0x105   : > { %s409_s28 = scalar_lea.sflag [#allocation3], %s408_s27 }
 0x106   : > { %p509_p2 = pnand %p512_p1, %p673_p6 }
 0x108   : > { %593 = dma.done.wait (!%p509_p2), %s409_s28, 640  }
 0x109   : > { %595 = vsyncadd (!%p509_p2), %s409_s28, 4294966656  ;;  %p12_p3 = scmp.ge.s32.totalorder %s656_s15, 6   ;;  %s800_s9 = smov %s602_s10 }
 0x10a   : > { %s801_s10 = smov %s606_s11  ;;  %s802_s11 = smov %s667_s18 }
 0x10b   : > { %s803_s12 = smov %s656_s15  ;;  %14 = sbr.rel (!%p12_p3) target bundleno = 3 (0x3), region = 63 }
 0x112   :  { %414 = vsyncpa [#allocation3], 1 }
 0x113   :  { %416 = vsyncpa [#allocation3 + $0x1], 1 }

</bundles_post_ra>
